<compile_context>
chip_gen: v5e
topology: v5e:2x2
jax: 0.10.0
libtpu: 0.0.40
codegen_flags: <defaults>
</compile_context>

<pallas_src>
import jax
import jax.numpy as jnp
from jax.experimental import pallas as pl
from jax.experimental.pallas import tpu as pltpu

_MIB = 1024 * 1024
_VMEM_TILE_BUDGET = 36 * _MIB   # tile footprint budget (safe on v7x's 64 MiB VMEM)
_VMEM_LIMIT_CAP = 48 * _MIB     # never ask Mosaic for more than this


# ---------------------------------------------------------------------------
# Tile selection
# ---------------------------------------------------------------------------
def _divisor_tiles(dim, align, cap):
    """Descending tile candidates: multiples of `align` that divide `dim`, <= cap.

    Falls back to the full extent (always a legal Pallas block) if none exist.
    """
    cands = [d for d in range(align, min(cap, dim) + 1, align) if dim % d == 0]
    cands.sort(reverse=True)
    return cands if cands else [dim]


def _select_tiles(M, K, N, x_bytes, w_bytes, out_bytes, compute_itemsize):
    """Pick (tm, tk, tn) maximizing reuse under a cross-generation VMEM budget."""
    # K / N tiles: largest 128-multiple divisors (full extent only as fallback).
    tk = _divisor_tiles(K, 128, 1024)[0]
    tn = _divisor_tiles(N, 128, 1024)[0]
    # M tile: the arithmetic-intensity lever (weight HBM reads = M/tm full passes).
    # bf16 compute keeps tm >= 16 (one packed vreg is [16, 128]).
    tm_min = 16 if compute_itemsize <= 2 else 8
    tm_cands = _divisor_tiles(M, tm_min, 1024)

    def footprint(tm):
        return (2 * tm * tk * x_bytes        # double-buffered activation tiles
                + 2 * tk * tn * w_bytes      # double-buffered weight tiles
                + 2 * tm * tn * out_bytes    # double-buffered output tiles
                + tm * tn * 4)               # f32 accumulator scratch

    tm = next((t for t in tm_cands if footprint(t) <= _VMEM_TILE_BUDGET),
              tm_cands[-1])
    # TODO(synk): for very large K/N that are not 128-multiples the full-extent
    # fallback can still exceed the budget; pad K/N to a 128-multiple upstream.
    return tm, tk, tn, footprint(tm)


def _vmem_limit(footprint):
    return int(min(_VMEM_LIMIT_CAP, max(32 * _MIB, footprint + 8 * _MIB)))


# ---------------------------------------------------------------------------
# Pallas kernel (shared body; k reduction axis position passed in)
# ---------------------------------------------------------------------------
def _make_matmul_kernel(k_axis, compute_dtype, precision):
    def kernel(x_ref, w_ref, o_ref, acc_ref):
        k = pl.program_id(k_axis)
        x = x_ref[...].astype(compute_dtype)   # in-kernel cast (no wrapper pass)
        prod = jnp.dot(x, w_ref[...],
                       preferred_element_type=jnp.float32, precision=precision)

        @pl.when(k == 0)
        def _first():      # direct write: no zero-fill store + redundant add
            acc_ref[...] = prod

        @pl.when(k != 0)
        def _accum():
            acc_ref[...] += prod

        @pl.when(k == pl.num_programs(k_axis) - 1)
        def _store():
            o_ref[...] = acc_ref[...].astype(o_ref.dtype)

    return kernel


def _precision_for(compute_dtype):
    return (jax.lax.Precision.HIGHEST if compute_dtype == jnp.float32
            else jax.lax.Precision.DEFAULT)


# ---------------------------------------------------------------------------
# pallas_call wrappers
# ---------------------------------------------------------------------------
def merge_matmul_flat(x2d, w_flat, *, out_dtype):
    """out = x2d @ w_flat with a single lane-dense N axis (dup folded into N).

    x2d:    (M, K)   activations (original dtype; cast per-tile in kernel)
    w_flat: (K, N)   pre-transposed weight, N = dup * chunk_size
    returns (M, N)
    """
    M, K = x2d.shape
    K2, N = w_flat.shape
    assert K == K2, (K, K2)
    compute_dtype = w_flat.dtype
    x_b = jnp.dtype(x2d.dtype).itemsize
    w_b = jnp.dtype(compute_dtype).itemsize
    o_b = jnp.dtype(out_dtype).itemsize
    tm, tk, tn, fp = _select_tiles(M, K, N, x_b, w_b, o_b, w_b)

    cost = pl.CostEstimate(
        flops=2 * M * K * N, transcendentals=0,
        bytes_accessed=M * K * x_b + K * N * w_b + M * N * o_b)

    return pl.pallas_call(
        _make_matmul_kernel(2, compute_dtype, _precision_for(compute_dtype)),
        out_shape=jax.ShapeDtypeStruct((M, N), out_dtype),
        grid_spec=pltpu.PrefetchScalarGridSpec(
            num_scalar_prefetch=0,
            grid=(M // tm, N // tn, K // tk),
            in_specs=[
                pl.BlockSpec((tm, tk), lambda i, j, k: (i, k)),
                pl.BlockSpec((tk, tn), lambda i, j, k: (k, j)),
            ],
            out_specs=pl.BlockSpec((tm, tn), lambda i, j, k: (i, j)),
            scratch_shapes=[pltpu.VMEM((tm, tn), jnp.float32)],
        ),
        compiler_params=pltpu.CompilerParams(
            dimension_semantics=("parallel", "parallel", "arbitrary"),
            vmem_limit_bytes=_vmem_limit(fp)),
        cost_estimate=cost,
    )(x2d, w_flat)


def merge_matmul_chunked(x2d, w_chunks, *, out_dtype):
    """out[d] = x2d @ w_chunks[d]   (chunk axis squeezed in the grid).

    x2d:      (M, K)          activations
    w_chunks: (dup, K, Nc)    pre-transposed, pre-chunked weight (Nc % 128 == 0)
    returns   (dup, M, Nc)
    """
    M, K = x2d.shape
    dup, K2, Nc = w_chunks.shape
    assert K == K2, (K, K2)
    compute_dtype = w_chunks.dtype
    x_b = jnp.dtype(x2d.dtype).itemsize
    w_b = jnp.dtype(compute_dtype).itemsize
    o_b = jnp.dtype(out_dtype).itemsize
    tm, tk, tn, fp = _select_tiles(M, K, Nc, x_b, w_b, o_b, w_b)

    cost = pl.CostEstimate(
        flops=2 * M * K * dup * Nc, transcendentals=0,
        bytes_accessed=M * K * x_b + dup * K * Nc * w_b + dup * M * Nc * o_b)

    return pl.pallas_call(
        _make_matmul_kernel(3, compute_dtype, _precision_for(compute_dtype)),
        out_shape=jax.ShapeDtypeStruct((dup, M, Nc), out_dtype),
        grid_spec=pltpu.PrefetchScalarGridSpec(
            num_scalar_prefetch=0,
            grid=(dup, M // tm, Nc // tn, K // tk),
            in_specs=[
                pl.BlockSpec((tm, tk), lambda d, i, j, k: (i, k)),
                pl.BlockSpec((None, tk, tn), lambda d, i, j, k: (d, k, j)),
            ],
            out_specs=pl.BlockSpec((None, tm, tn), lambda d, i, j, k: (d, i, j)),
            scratch_shapes=[pltpu.VMEM((tm, tn), jnp.float32)],
        ),
        compiler_params=pltpu.CompilerParams(
            dimension_semantics=("parallel", "parallel", "parallel", "arbitrary"),
            vmem_limit_bytes=_vmem_limit(fp)),
        cost_estimate=cost,
    )(x2d, w_chunks)


# ---------------------------------------------------------------------------
# Module wrapper (forward only)
# ---------------------------------------------------------------------------
class MergeParallelLayer:
    """JAX/Pallas port of the PyTorch MergeParallelLayer (forward only)."""

    def __init__(self, row_size: int, col_size: int, dup_layer: int,
                 world_size: int, rank: int, key: jax.Array,
                 compute_dtype=jnp.float32):
        assert col_size % world_size == 0
        self.row_size = row_size
        self.col_size = col_size
        self.dup_layer = dup_layer
        self.world_size = world_size
        self.rank = rank
        self.compute_dtype = compute_dtype

        out_features = col_size * dup_layer // world_size
        assert out_features % dup_layer == 0
        self.out_features = out_features
        self.chunk_size = out_features // dup_layer

        # Deterministic init matching nn.Linear's (out, in) weight layout.
        bound = 1.0 / (row_size ** 0.5)
        w = jax.random.uniform(key, (out_features, row_size), dtype=jnp.float32,
                               minval=-bound, maxval=bound)
        self._set_weight(w)

    def _set_weight(self, w: jax.Array):
        """Store torch-layout weight and its pre-transposed compute layout (once)."""
        self.weight = w                                    # (out_features, row_size)
        wt = w.T.astype(self.compute_dtype)                # (row_size, out_features)
        # Lane-dense flat layout when chunk_size is small / not a 128-multiple;
        # pre-chunked (dup, K, Nc) layout otherwise (chunks = leading-axis slices).
        self.use_flat = (self.chunk_size % 128) != 0
        if self.use_flat:
            self.weight_mat = wt                           # (K, dup*Nc)
        else:
            self.weight_mat = (
                wt.reshape(self.row_size, self.dup_layer, self.chunk_size)
                  .transpose(1, 0, 2))                     # (dup, K, Nc)

    def load_weight(self, w_list):
        """Mirror of the torch load_weight: pick this rank's shard."""
        self._set_weight(jnp.asarray(w_list[self.rank], dtype=jnp.float32))
        # TODO(synk): no torch.distributed process group here; rank/world_size are metadata only.

    def __call__(self, x: jax.Array):
        lead = x.shape[:-1]
        out_dtype = x.dtype
        Nc = self.chunk_size
        x2d = x.reshape(-1, self.row_size)   # no wrapper cast; cast happens in-kernel
        if self.use_flat:
            out2d = merge_matmul_flat(x2d, self.weight_mat, out_dtype=out_dtype)
            return tuple(out2d[:, d * Nc:(d + 1) * Nc].reshape(*lead, Nc)
                         for d in range(self.dup_layer))
        out3 = merge_matmul_chunked(x2d, self.weight_mat, out_dtype=out_dtype)
        return tuple(out3[d].reshape(*lead, Nc) for d in range(self.dup_layer))


# ---------------------------------------------------------------------------
# Self-test
# ---------------------------------------------------------------------------
if __name__ == "__main__":
    key = jax.random.PRNGKey(0)
    k_x, k_w, k_w2 = jax.random.split(key, 3)

    batch, seq = 2, 8
    world_size, rank = 1, 0

    # --- Path 1: small chunk (64 < 128) -> flat lane-dense layout, f32 ------
    row_size, col_size, dup_layer = 32, 64, 2
    chunk_size = col_size * dup_layer // world_size // dup_layer
    x = jax.random.normal(k_x, (batch, seq, row_size), dtype=jnp.float32)

    layer = MergeParallelLayer(row_size, col_size, dup_layer, world_size, rank,
                               key=k_w, compute_dtype=jnp.float32)
    outs = jax.block_until_ready(layer(x))

    ref_full = jnp.matmul(x, layer.weight.T, precision=jax.lax.Precision.HIGHEST)
    ref_chunks = jnp.split(ref_full, dup_layer, axis=-1)
    assert len(outs) == dup_layer
    for got, ref in zip(outs, ref_chunks):
        assert got.shape == (batch, seq, chunk_size)
        assert jnp.allclose(got, ref, atol=1e-5, rtol=1e-5)

    # --- Path 2: 128-multiple chunk -> pre-chunked (dup, K, Nc), bf16 -------
    row_size2, col_size2, dup2 = 32, 128, 2
    chunk2 = col_size2 * dup2 // world_size // dup2
    x2 = jax.random.normal(k_x, (batch, seq, row_size2), dtype=jnp.float32)

    layer2 = MergeParallelLayer(row_size2, col_size2, dup2, world_size, rank,
                                key=k_w2, compute_dtype=jnp.bfloat16)
    outs2 = jax.block_until_ready(layer2(x2))

    x_b = x2.astype(jnp.bfloat16).astype(jnp.float32)
    w_b = layer2.weight.astype(jnp.bfloat16).astype(jnp.float32)
    ref2 = jnp.split(jnp.matmul(x_b, w_b.T), dup2, axis=-1)
    for got, ref in zip(outs2, ref2):
        assert got.shape == (batch, seq, chunk2)
        assert jnp.allclose(got.astype(jnp.float32), ref, atol=2e-2, rtol=2e-2)

    print("KERNEL_OK")
</pallas_src>

<mosaic_0001>
module attributes {stable_mosaic.version = 11 : i64} {
  func.func @kernel(%arg0: i32, %arg1: i32, %arg2: i32, %arg3: memref<16x32xf32, #tpu.memory_space<vmem>>, %arg4: memref<32x128xf32, #tpu.memory_space<vmem>>, %arg5: memref<16x128xf32, #tpu.memory_space<vmem>>, %arg6: memref<16x128xf32, #tpu.memory_space<vmem>>) attributes {dimension_semantics = [#tpu.dimension_semantics<parallel>, #tpu.dimension_semantics<parallel>, #tpu.dimension_semantics<arbitrary>], iteration_bounds = array<i64: 1, 1, 1>, scalar_prefetch = 0 : i64, scratch_operands = 1 : i64, tpu.core_type = #tpu.core_type<tc>, window_params = [{transform_indices = @transform_0, window_bounds = array<i64: 16, 32>}, {transform_indices = @transform_1, window_bounds = array<i64: 32, 128>}, {transform_indices = @transform_2, window_bounds = array<i64: 16, 128>}]} {
    %c0 = arith.constant 0 : index
    %c0_0 = arith.constant 0 : index
    %0 = vector.load %arg3[%c0, %c0_0] : memref<16x32xf32, #tpu.memory_space<vmem>>, vector<16x32xf32>
    %c0_1 = arith.constant 0 : index
    %c0_2 = arith.constant 0 : index
    %1 = vector.load %arg4[%c0_1, %c0_2] : memref<32x128xf32, #tpu.memory_space<vmem>>, vector<32x128xf32>
    %cst = arith.constant dense<0.000000e+00> : vector<16x128xf32>
    %2 = tpu.matmul %0, %1, %cst {dimension_numbers = #tpu.dot_dimension_numbers<[1], [0], [0], [1], [0, 0, 1, 1], [], []>, precision = #tpu.contract_precision<fp32>} : vector<16x32xf32>, vector<32x128xf32>, vector<16x128xf32> -> vector<16x128xf32>
    %c0_i32 = arith.constant 0 : i32
    %3 = arith.cmpi eq, %arg2, %c0_i32 : i32
    %4 = arith.extui %3 : i1 to i32
    %c0_i32_3 = arith.constant 0 : i32
    %5 = arith.cmpi ne, %4, %c0_i32_3 : i32
    scf.if %5 {
      %c0_8 = arith.constant 0 : index
      %c0_9 = arith.constant 0 : index
      %12 = vector.load %arg6[%c0_8, %c0_9] : memref<16x128xf32, #tpu.memory_space<vmem>>, vector<16x128xf32>
      tpu.vector_store %arg6[%c0_8, %c0_9], %2 {strides = array<i32>} : memref<16x128xf32, #tpu.memory_space<vmem>>, vector<16x128xf32>,
    } else {
    }
    %c0_i32_4 = arith.constant 0 : i32
    %6 = arith.cmpi ne, %arg2, %c0_i32_4 : i32
    %7 = arith.extui %6 : i1 to i32
    %c0_i32_5 = arith.constant 0 : i32
    %8 = arith.cmpi ne, %7, %c0_i32_5 : i32
    scf.if %8 {
      %c0_8 = arith.constant 0 : index
      %c0_9 = arith.constant 0 : index
      %12 = vector.load %arg6[%c0_8, %c0_9] : memref<16x128xf32, #tpu.memory_space<vmem>>, vector<16x128xf32>
      %13 = arith.addf %12, %2 : vector<16x128xf32>
      %c0_10 = arith.constant 0 : index
      %c0_11 = arith.constant 0 : index
      %14 = vector.load %arg6[%c0_10, %c0_11] : memref<16x128xf32, #tpu.memory_space<vmem>>, vector<16x128xf32>
      tpu.vector_store %arg6[%c0_10, %c0_11], %13 {strides = array<i32>} : memref<16x128xf32, #tpu.memory_space<vmem>>, vector<16x128xf32>,
    } else {
    }
    %c0_i32_6 = arith.constant 0 : i32
    %9 = arith.cmpi eq, %arg2, %c0_i32_6 : i32
    %10 = arith.extui %9 : i1 to i32
    %c0_i32_7 = arith.constant 0 : i32
    %11 = arith.cmpi ne, %10, %c0_i32_7 : i32
    scf.if %11 {
      %c0_8 = arith.constant 0 : index
      %c0_9 = arith.constant 0 : index
      %12 = vector.load %arg6[%c0_8, %c0_9] : memref<16x128xf32, #tpu.memory_space<vmem>>, vector<16x128xf32>
      %c0_10 = arith.constant 0 : index
      %c0_11 = arith.constant 0 : index
      %13 = vector.load %arg5[%c0_10, %c0_11] : memref<16x128xf32, #tpu.memory_space<vmem>>, vector<16x128xf32>
      tpu.vector_store %arg5[%c0_10, %c0_11], %12 {strides = array<i32>} : memref<16x128xf32, #tpu.memory_space<vmem>>, vector<16x128xf32>,
    } else {
    }
    return
  }
  func.func @transform_0(%arg0: i32, %arg1: i32, %arg2: i32) -> (i32, i32) {
    %c0_i32 = arith.constant 0 : i32
    return %arg0, %arg2 : i32, i32
  }
  func.func @transform_1(%arg0: i32, %arg1: i32, %arg2: i32) -> (i32, i32) {
    %c0_i32 = arith.constant 0 : i32
    return %arg2, %arg1 : i32, i32
  }
  func.func @transform_2(%arg0: i32, %arg1: i32, %arg2: i32) -> (i32, i32) {
    %c0_i32 = arith.constant 0 : i32
    return %arg0, %arg1 : i32, i32
  }
}

</mosaic_0001>

<bundles_post_ra>
// kernel: tpu_custom_call.1
= control target key start
LH: loop header
LB: loop body
LE: loop exit
PB: predicated region body
PF: predicated region fallthrough
CT: control target
= control target key end

     0   :  { %7 = vsyncpa [#allocation4], 0  ;;  %s472_s0 = inlined_call_operand.hbm [shape: f32[16,32], index: 0, kind: input, shape index: {}]   ;;  %s473_s1 = inlined_call_operand.hbm [shape: f32[32,128], index: 1, kind: input, shape index: {}]   ;;  %s474_s2 = inlined_call_operand.hbm [shape: f32[16,128], index: 2, kind: output, shape index: {}]  }
   0x1   :  { %8 = vsyncpa [#allocation7], 0 }
   0x2   :  { %9 = vsyncpa [#allocation5], 0  ;;  %s14_s11 = sshll.u32 %s472_s0, 4  ;;  %s407_s12 = smov [#allocation3]   ;;  %s15_s11 = int_to_ptr.hbm [resolvable:$true] %s14_s11 }
   0x3   :  { %s16_s13 = sshll.u32 %s407_s12, 4  ;;  %s27_s16 = sshll.u32 %s473_s1, 4  ;;  %s17_s13 = int_to_ptr.vmem [resolvable:$true] %s16_s13  ;;  %s28_s16 = int_to_ptr.hbm [resolvable:$true] %s27_s16 }
   0x4   :  { %s408_s17 = smov 128   ;;  %s409_s18 = smov 8  }
   0x5   :  { %22 = dma.hbm_to_vmem [thread:$0]  %s15_s11, 256, %s17_s13, [#allocation4], %s408_s17, %s408_s17, %s409_s18  }
   0x6   :  { %s410_s19 = smov [#allocation6]  }
   0x7   :  { %s29_s20 = sshll.u32 %s410_s19, 4  ;;  %s30_s20 = int_to_ptr.vmem [resolvable:$true] %s29_s20 }
   0x8   :  { %35 = dma.hbm_to_vmem [thread:$0]  %s28_s16, 512, %s30_s20, [#allocation7], %s408_s17, %s408_s17, %s409_s18  }
   0x9   :  { %401 = dma.done.wait [#allocation4], 256  }
   0xa   :  { %402 = vsyncadd [#allocation4], 4294967040 }
   0xb   :  { %403 = dma.done.wait [#allocation7], 512  }
   0xc   :  { %404 = vsyncadd [#allocation7], 4294966784  ;;  %vm50_vm0 = vcmask 261120   ;;  %v49_v0 = vld [vmem:[#allocation6 + $0x18] sm:$0xff]  ;;  %v48_v1 = vld [vmem:[#allocation6 + $0x10] sm:$0xff]  ;;  %s411_s0 = smov [#allocation8]  }
   0xd   :  { %v47_v2 = vld [vmem:[#allocation6 + $0x8] sm:$0xff]  ;;  %v69_v3 = vand.u32 4294901760, %v49_v0  ;;  %v439_v4 = vand.u32 4294901760, %v48_v1  ;;  %v46_v6 = vld [vmem:[#allocation6] sm:$0xff]  ;;  %v45_v7 = vld [vmem:[#allocation3 + $0x8] sm:$0xff]  ;;  %s300_s1 = sshll.u32 %s411_s0, 4  ;;  %s301_s1 = int_to_ptr.vmem [resolvable:$true] %s300_s1 }
   0xe   :  { %v441_v5 = vand.u32 4294901760, %v47_v2  ;;  %v44_v8 = vld [vmem:[#allocation3] sm:$0xff]  ;;  %v443_v9 = vand.u32 4294901760, %v46_v6  ;;  %v55_v10 = vsel %vm50_vm0, %v45_v7, 0  ;;  %s302_s23 = sshll.u32 %s474_s2, 4  ;;  %s303_s23 = int_to_ptr.hbm [resolvable:$true] %s302_s23 }
   0xf   :  { %v52_v11 = vsel %vm50_vm0, %v44_v8, 0  ;;  %316 = vmatpush.msra.mxu2 %v69_v3  ;;  %v107_v12 = vsub.f32 %v49_v0, %v69_v3  ;;  %v445_v13 = vand.u32 4294901760, %v55_v10  ;;  %v113_v14 = vsub.f32 %v48_v1, %v439_v4  ;;  %70 = vmatpush.msra.mxu0 %v69_v3 }
  0x10   :  { %v119_v15 = vsub.f32 %v47_v2, %v441_v5  ;;  %v125_v16 = vsub.f32 %v46_v6, %v443_v9  ;;  %v77_v17 = vand.u32 4294901760, %v52_v11 }
  0x11   :  { %317 = vmatpush.msra.mxu2 %v439_v4  ;;  %v108_v18 = vand.u32 4294901760, %v107_v12  ;;  %v86_v19 = vsub.f32 %v55_v10, %v445_v13  ;;  %v114_v20 = vand.u32 4294901760, %v113_v14  ;;  %72 = vmatpush.msra.mxu0 %v439_v4 }
  0x12   :  { %v120_v21 = vand.u32 4294901760, %v119_v15  ;;  %v126_v22 = vand.u32 4294901760, %v125_v16  ;;  %v78_v23 = vsub.f32 %v52_v11, %v77_v17 }
  0x13   :  { %318 = vmatpush.msra.mxu2 %v441_v5  ;;  %v109_v24 = vsub.f32 %v107_v12, %v108_v18  ;;  %v87_v25 = vand.u32 4294901760, %v86_v19  ;;  %v115_v26 = vsub.f32 %v113_v14, %v114_v20  ;;  %74 = vmatpush.msra.mxu0 %v441_v5 }
  0x14   :  { %v121_v27 = vsub.f32 %v119_v15, %v120_v21  ;;  %v79_v28 = vand.u32 4294901760, %v78_v23  ;;  %v127_v32 = vsub.f32 %v125_v16, %v126_v22 }
  0x15   :  { %319 = vmatpush.msra.mxu2 %v443_v9  ;;  %v110_v29 = vand.u32 4294901760, %v109_v24  ;;  %v88_v30 = vsub.f32 %v86_v19, %v87_v25  ;;  %v116_v31 = vand.u32 4294901760, %v115_v26  ;;  %76 = vmatpush.msra.mxu0 %v443_v9 }
  0x16   :  { %v80_v33 = vsub.f32 %v78_v23, %v79_v28  ;;  %v122_v35 = vand.u32 4294901760, %v121_v27  ;;  %v128_v37 = vand.u32 4294901760, %v127_v32 }
  0x17   :  { %153 = vmatpush.msrb.mxu2 %v107_v12  ;;  %222 = vmatpush.msrb.mxu0 %v108_v18  ;;  %v89_v34 = vand.u32 4294901760, %v88_v30 }
  0x18   :  { %320 = vmatpush.msra.mxu3 %v110_v29  ;;  %111 = vmatpush.msra.mxu1 %v110_v29  ;;  %v81_v36 = vand.u32 4294901760, %v80_v33 }
  0x19   :  { %156 = vmatpush.msrb.mxu2 %v113_v14  ;;  %226 = vmatpush.msrb.mxu0 %v114_v20 }
  0x1a   :  { %90 = vmatmul.f32.vlgmr.msra.gmra.mxu2 %v89_v34  ;;  %321 = vmatpush.msra.mxu3 %v116_v31 }
  0x1b   :  { %159 = vmatpush.msrb.mxu2 %v119_v15  ;;  %117 = vmatpush.msra.mxu1 %v116_v31 }
  0x1c   :  { %322 = vmatpush.msra.mxu3 %v122_v35  ;;  %82 = vmatmul.f32.vlgmr.msra.gmra.mxu0 %v81_v36 }
  0x1d   :  { %162 = vmatpush.msrb.mxu2 %v125_v16  ;;  %123 = vmatpush.msra.mxu1 %v122_v35 }
  0x1e   :  { %323 = vmatpush.msra.mxu3 %v128_v37  ;;  %230 = vmatpush.msrb.mxu0 %v120_v21 }
  0x1f   :  { %135 = vmatmul.f32.vlgmr.msra.gmra.mxu3 %v445_v13  ;;  %129 = vmatpush.msra.mxu1 %v128_v37 }
  0x20   :  { %187 = vmatpush.msrb.mxu3 %v69_v3  ;;  %131 = vmatmul.f32.vlgmr.msra.gmra.mxu1 %v77_v17 }
  0x21   :  { %257 = vmatpush.msrb.mxu1 %v69_v3  ;;  %234 = vmatpush.msrb.mxu0 %v126_v22 }
  0x22   :  { %165 = vmatmul.f32.vlgmr.msrb.gmra.mxu2 %v78_v23  ;;  %189 = vmatpush.msrb.mxu3 %v439_v4 }
  0x23   :  { %259 = vmatpush.msrb.mxu1 %v439_v4 }
  0x24   :  { %191 = vmatpush.msrb.mxu3 %v441_v5  ;;  %236 = vmatmul.f32.vlgmr.msrb.gmra.mxu0 %v77_v17 }
  0x25   :  { %261 = vmatpush.msrb.mxu1 %v441_v5 }
  0x26   :  { %193 = vmatpush.msrb.mxu3 %v443_v9 }
  0x27   :  { %197 = vmatmul.f32.vlgmr.msrb.gmra.mxu3 %v79_v28  ;;  %263 = vmatpush.msrb.mxu1 %v443_v9 }
  0x28   :  { %265 = vmatmul.f32.vlgmr.msrb.gmra.mxu1 %v77_v17 }
  0x2a   :  { %170 = vmatmul.f32.gmra.mxu2 %v86_v19 }
  0x2c   :  { %240 = vmatmul.f32.gmra.mxu0 %v445_v13 }
  0x2f   :  { %203 = vmatmul.f32.gmra.mxu3 %v87_v25 }
  0x30   :  { %269 = vmatmul.f32.gmra.mxu1 %v445_v13 }
  0x99   :  { %v83_v39 = vpop.f32.mrf.mxu0 }
  0x9d   :  { %v91_v38 = vpop.f32.mrf.mxu2  ;;  %v132_v41 = vpop.f32.mrf.mxu1 }
  0x9e   :  { %v133_v42 = vadd.f32 %v132_v41, %v83_v39 }
  0xa1   :  { %v237_v44 = vpop.f32.mrf.mxu0 }
  0xa2   :  { %v136_v40 = vpop.f32.mrf.mxu3 }
  0xa3   :  { %v137_v51 = vadd.f32 %v136_v40, %v91_v38 }
  0xa5   :  { %v166_v43 = vpop.f32.mrf.mxu2  ;;  %v266_v47 = vpop.f32.mrf.mxu1 }
  0xa6   :  { %v167_v45 = vadd.f32 %v166_v43, %v133_v42 }
  0xa9   :  { %v241_v55 = vpop.f32.mrf.mxu0 }
  0xaa   :  { %v198_v46 = vpop.f32.mrf.mxu3 }
  0xab   :  { %v199_v48 = vadd.f32 %v198_v46, %v167_v45 }
  0xad   :  { %v238_v49 = vadd.f32 %v237_v44, %v199_v48  ;;  %v171_v50 = vpop.f32.mrf.mxu2  ;;  %v270_v57 = vpop.f32.mrf.mxu1 }
  0xae   :  { %v172_v53 = vadd.f32 %v171_v50, %v137_v51 }
  0xaf   :  { %v267_v52 = vadd.f32 %v266_v47, %v238_v49 }
  0xb1   :  { %294 = vst [vmem:[#allocation8] sm:$0xff] %v267_v52 }
  0xb2   :  { %v204_v54 = vpop.f32.mrf.mxu3 }
  0xb3   :  { %v205_v56 = vadd.f32 %v204_v54, %v172_v53 }
  0xb5   :  { %v242_v58 = vadd.f32 %v241_v55, %v205_v56 }
  0xb7   :  { %v271_v59 = vadd.f32 %v270_v57, %v242_v58 }
  0xb9   :  { %295 = vst [vmem:[#allocation8 + $0x8] sm:$0xff] %v271_v59 }
  0xba   :  { %308 = dma.vmem_to_hbm [thread:$0]  %s301_s1, 256, %s303_s23, [#allocation5], %s408_s17, %s408_s17, %s409_s18  }
  0xbb   :  { %405 = dma.done.wait [#allocation5], 256  }
  0xbc   :  { %406 = vsyncadd [#allocation5], 4294967040 }
  0xbd   :  { %313 = vsyncpa [#allocation4], 1 }
  0xbe   :  { %314 = vsyncpa [#allocation7], 1 }
  0xbf   :  { %315 = vsyncpa [#allocation5], 1 }

</bundles_post_ra>
